<compile_context>
chip_gen: v6e
topology: v6e:2x2x1
jax: 0.10.0
libtpu: 0.0.40
codegen_flags: <defaults>
</compile_context>

<pallas_src>
import math
from functools import partial

import jax
import jax.numpy as jnp
from jax.experimental import pallas as pl
from jax.experimental.pallas import tpu as pltpu


def _gmu_kernel(x1_ref, x2_ref, wa_ref, wb_ref, out_ref, gates_ref):
    # x1_ref/x2_ref: (TB, D) row tiles; wa_ref/wb_ref: (D, 2*Dout) resident.
    dout = out_ref.shape[-1]
    x1 = x1_ref[...]
    x2 = x2_ref[...]

    # Fused projections: columns [0:Dout] = hidden pre-activation,
    # columns [Dout:2*Dout] = gate partial sums (g = g1 + g2).
    p1 = jnp.dot(x1, wa_ref[...], preferred_element_type=jnp.float32)
    p2 = jnp.dot(x2, wb_ref[...], preferred_element_type=jnp.float32)

    h1 = jnp.tanh(p1[:, :dout])
    h2 = jnp.tanh(p2[:, :dout])
    z = jax.nn.sigmoid(p1[:, dout:] + p2[:, dout:])
    one_minus_z = 1.0 - z

    fused = (z * h1 * x1.astype(jnp.float32)
             + one_minus_z * h2 * x2.astype(jnp.float32))
    out_ref[...] = fused.astype(out_ref.dtype)

    # Two static lane-slice stores instead of materializing a concat.
    gates_ref[:, :dout] = z.astype(gates_ref.dtype)
    gates_ref[:, dout:] = one_minus_z.astype(gates_ref.dtype)


def _round_up(n, m):
    return ((n + m - 1) // m) * m


def prepare_weights(w1, w2, wg, dtype=None):
    """One-time relayout: PyTorch (out, in) weights -> fused (in, 2*out) slabs.

    wa = [W1^T | Wg1^T]  (D1, 2*Dout),  wb = [W2^T | Wg2^T]  (D2, 2*Dout)
    so cat(x1,x2) @ Wg.T == (x1 @ wa + x2 @ wb)[:, Dout:].
    Keep weights in the activation dtype (bf16 weights for bf16 activations).
    """
    Dout, D1 = w1.shape
    _, D2 = w2.shape
    assert w2.shape == (Dout, D2)
    assert wg.shape == (Dout, D1 + D2)
    if dtype is None:
        dtype = w1.dtype
    wa = jnp.concatenate([w1.T, wg[:, :D1].T], axis=1).astype(dtype)
    wb = jnp.concatenate([w2.T, wg[:, D1:].T], axis=1).astype(dtype)
    return wa, wb


@partial(jax.jit, static_argnames=("block_rows",))
def gated_multimodal_forward(x1, x2, wa, wb, *, block_rows=512):
    """Fused GMU forward.

    x1: (..., D1), x2: (..., D2); wa: (D1, 2*Dout), wb: (D2, 2*Dout) from
    prepare_weights().  Returns (out (..., Dout), gates (..., 2*Dout)).
    """
    D1 = x1.shape[-1]
    D2 = x2.shape[-1]
    two_dout = wa.shape[1]
    Dout = two_dout // 2
    assert wa.shape == (D1, two_dout) and wb.shape == (D2, two_dout)
    # z*h1*x1 and (1-z)*h2*x2 require matching feature sizes (as in the module).
    assert Dout == D1 == D2

    lead = x1.shape[:-1]
    x1f = x1.reshape(-1, D1)
    x2f = x2.reshape(-1, D2)
    B = x1f.shape[0]

    # Native sublane packing of the activation dtype (8 rows per f32 vreg,
    # 16 for bf16, 32 for int8/fp8) -> avoids sub-native tiles / masked stores.
    itemsize = jnp.dtype(x1.dtype).itemsize
    row_align = {4: 8, 2: 16, 1: 32}.get(itemsize, 8)

    TB = min(block_rows, _round_up(B, row_align))
    # v7x has 2 TensorCores: make sure the (parallel) grid has >= 2 steps
    # whenever the batch is big enough to split.
    if B >= 2 * row_align:
        TB = min(TB, _round_up(pl.cdiv(B, 2), row_align))
    TB = max(_round_up(TB, row_align), row_align)
    grid = pl.cdiv(B, TB)  # partial last block handled by Pallas (masked store)

    out, gates = pl.pallas_call(
        _gmu_kernel,
        out_shape=(
            jax.ShapeDtypeStruct((B, Dout), x1.dtype),
            jax.ShapeDtypeStruct((B, 2 * Dout), x1.dtype),
        ),
        grid_spec=pltpu.PrefetchScalarGridSpec(
            num_scalar_prefetch=0,
            grid=(grid,),
            in_specs=[
                pl.BlockSpec((TB, D1), lambda i: (i, 0)),            # x1 row tile
                pl.BlockSpec((TB, D2), lambda i: (i, 0)),            # x2 row tile
                pl.BlockSpec((D1, 2 * Dout), lambda i: (0, 0)),      # Wa (resident)
                pl.BlockSpec((D2, 2 * Dout), lambda i: (0, 0)),      # Wb (resident)
            ],
            out_specs=(
                pl.BlockSpec((TB, Dout), lambda i: (i, 0)),          # fused output
                pl.BlockSpec((TB, 2 * Dout), lambda i: (i, 0)),      # cat(z, 1-z)
            ),
        ),
        compiler_params=pltpu.CompilerParams(
            dimension_semantics=("parallel",),
            vmem_limit_bytes=32 * 1024 * 1024,  # safe on v5e/v6e/v7x
        ),
    )(x1f, x2f, wa, wb)

    out = out.reshape(lead + (Dout,))
    gates = gates.reshape(lead + (2 * Dout,))
    return out, gates


def _reference_forward(x1, x2, w1, w2, wg):
    """Pure-JAX reference matching the PyTorch module exactly."""
    h1 = jnp.tanh(x1 @ w1.T)
    h2 = jnp.tanh(x2 @ w2.T)
    xcat = jnp.concatenate([x1, x2], axis=-1)
    z = jax.nn.sigmoid(xcat @ wg.T)
    out = z * h1 * x1 + (1.0 - z) * h2 * x2
    return out, jnp.concatenate([z, 1.0 - z], axis=-1)


if __name__ == "__main__":
    key = jax.random.PRNGKey(0)
    B = 16          # small batch of rows
    D = 128         # size_in1 == size_in2 == size_out (required by z*h1*xs[0])

    k1, k2, k3, k4, k5 = jax.random.split(key, 5)
    x1 = jax.random.normal(k1, (B, D), jnp.float32)
    x2 = jax.random.normal(k2, (B, D), jnp.float32)

    bound = 1.0 / math.sqrt(D)            # PyTorch default nn.Linear init range
    w1 = jax.random.uniform(k3, (D, D), jnp.float32, -bound, bound)
    w2 = jax.random.uniform(k4, (D, D), jnp.float32, -bound, bound)
    bound_g = 1.0 / math.sqrt(2 * D)
    wg = jax.random.uniform(k5, (D, 2 * D), jnp.float32, -bound_g, bound_g)

    # One-time weight relayout (kept out of the jit'ed hot path).
    wa, wb = prepare_weights(w1, w2, wg, dtype=x1.dtype)

    out, gates = gated_multimodal_forward(x1, x2, wa, wb)
    out, gates = jax.block_until_ready((out, gates))

    ref_out, ref_gates = _reference_forward(x1, x2, w1, w2, wg)
    assert out.shape == (B, D) and gates.shape == (B, 2 * D), (out.shape, gates.shape)
    assert bool(jnp.all(jnp.isfinite(out))) and bool(jnp.all(jnp.isfinite(gates)))
    assert bool(jnp.allclose(out, ref_out, atol=1e-4, rtol=1e-4)), \
        float(jnp.max(jnp.abs(out - ref_out)))
    assert bool(jnp.allclose(gates, ref_gates, atol=1e-4, rtol=1e-4)), \
        float(jnp.max(jnp.abs(gates - ref_gates)))

    print("KERNEL_OK")
</pallas_src>

<mosaic_0001>
module attributes {stable_mosaic.version = 11 : i64} {
  func.func @_gmu_kernel(%arg0: i32, %arg1: memref<8x128xf32, #tpu.memory_space<vmem>>, %arg2: memref<8x128xf32, #tpu.memory_space<vmem>>, %arg3: memref<128x256xf32, #tpu.memory_space<vmem>>, %arg4: memref<128x256xf32, #tpu.memory_space<vmem>>, %arg5: memref<8x128xf32, #tpu.memory_space<vmem>>, %arg6: memref<8x256xf32, #tpu.memory_space<vmem>>) attributes {dimension_semantics = [#tpu.dimension_semantics<parallel>], iteration_bounds = array<i64: 2>, scalar_prefetch = 0 : i64, scratch_operands = 0 : i64, tpu.core_type = #tpu.core_type<tc>, window_params = [{transform_indices = @transform_0, window_bounds = array<i64: 8, 128>}, {transform_indices = @transform_1, window_bounds = array<i64: 8, 128>}, {pipeline_mode = #tpu.pipeline_mode<synchronous>, transform_indices = @transform_2, window_bounds = array<i64: 128, 256>}, {pipeline_mode = #tpu.pipeline_mode<synchronous>, transform_indices = @transform_3, window_bounds = array<i64: 128, 256>}, {transform_indices = @transform_4, window_bounds = array<i64: 8, 128>}, {transform_indices = @transform_5, window_bounds = array<i64: 8, 256>}]} {
    %c0 = arith.constant 0 : index
    %c0_0 = arith.constant 0 : index
    %0 = vector.load %arg1[%c0, %c0_0] : memref<8x128xf32, #tpu.memory_space<vmem>>, vector<8x128xf32>
    %c0_1 = arith.constant 0 : index
    %c0_2 = arith.constant 0 : index
    %1 = vector.load %arg2[%c0_1, %c0_2] : memref<8x128xf32, #tpu.memory_space<vmem>>, vector<8x128xf32>
    %c0_3 = arith.constant 0 : index
    %c0_4 = arith.constant 0 : index
    %2 = vector.load %arg3[%c0_3, %c0_4] : memref<128x256xf32, #tpu.memory_space<vmem>>, vector<128x256xf32>
    %cst = arith.constant dense<0.000000e+00> : vector<8x256xf32>
    %3 = tpu.matmul %0, %2, %cst {dimension_numbers = #tpu.dot_dimension_numbers<[1], [0], [0], [1], [0, 0, 1, 1], [], []>} : vector<8x128xf32>, vector<128x256xf32>, vector<8x256xf32> -> vector<8x256xf32>
    %c0_5 = arith.constant 0 : index
    %c0_6 = arith.constant 0 : index
    %4 = vector.load %arg4[%c0_5, %c0_6] : memref<128x256xf32, #tpu.memory_space<vmem>>, vector<128x256xf32>
    %cst_7 = arith.constant dense<0.000000e+00> : vector<8x256xf32>
    %5 = tpu.matmul %1, %4, %cst_7 {dimension_numbers = #tpu.dot_dimension_numbers<[1], [0], [0], [1], [0, 0, 1, 1], [], []>} : vector<8x128xf32>, vector<128x256xf32>, vector<8x256xf32> -> vector<8x256xf32>
    %6 = vector.extract_strided_slice %3 {offsets = [0, 0], sizes = [8, 128], strides = [1, 1]} : vector<8x256xf32> to vector<8x128xf32>
    %7 = math.tanh %6 : vector<8x128xf32>
    %8 = vector.extract_strided_slice %5 {offsets = [0, 0], sizes = [8, 128], strides = [1, 1]} : vector<8x256xf32> to vector<8x128xf32>
    %9 = math.tanh %8 : vector<8x128xf32>
    %10 = vector.extract_strided_slice %3 {offsets = [0, 128], sizes = [8, 128], strides = [1, 1]} : vector<8x256xf32> to vector<8x128xf32>
    %11 = vector.extract_strided_slice %5 {offsets = [0, 128], sizes = [8, 128], strides = [1, 1]} : vector<8x256xf32> to vector<8x128xf32>
    %12 = arith.addf %10, %11 : vector<8x128xf32>
    %13 = arith.negf %12 : vector<8x128xf32>
    %14 = math.exp %13 : vector<8x128xf32>
    %cst_8 = arith.constant 1.000000e+00 : f32
    %15 = vector.broadcast %cst_8 : f32 to vector<8x128xf32>
    %16 = arith.addf %15, %14 : vector<8x128xf32>
    %17 = arith.divf %15, %16 : vector<8x128xf32>
    %cst_9 = arith.constant 1.000000e+00 : f32
    %18 = vector.broadcast %cst_9 : f32 to vector<8x128xf32>
    %19 = arith.subf %18, %17 : vector<8x128xf32>
    %20 = arith.mulf %17, %7 : vector<8x128xf32>
    %21 = arith.mulf %20, %0 : vector<8x128xf32>
    %22 = arith.mulf %19, %9 : vector<8x128xf32>
    %23 = arith.mulf %22, %1 : vector<8x128xf32>
    %24 = arith.addf %21, %23 : vector<8x128xf32>
    %c0_10 = arith.constant 0 : index
    %c0_11 = arith.constant 0 : index
    %25 = vector.load %arg5[%c0_10, %c0_11] : memref<8x128xf32, #tpu.memory_space<vmem>>, vector<8x128xf32>
    tpu.vector_store %arg5[%c0_10, %c0_11], %24 {strides = array<i32>} : memref<8x128xf32, #tpu.memory_space<vmem>>, vector<8x128xf32>,
    %c0_12 = arith.constant 0 : index
    %c0_13 = arith.constant 0 : index
    %26 = vector.load %arg6[%c0_12, %c0_13] : memref<8x256xf32, #tpu.memory_space<vmem>>, vector<8x128xf32>
    tpu.vector_store %arg6[%c0_12, %c0_13], %17 {strides = array<i32>} : memref<8x256xf32, #tpu.memory_space<vmem>>, vector<8x128xf32>,
    %c0_14 = arith.constant 0 : index
    %c128 = arith.constant 128 : index
    %27 = vector.load %arg6[%c0_14, %c128] : memref<8x256xf32, #tpu.memory_space<vmem>>, vector<8x128xf32>
    tpu.vector_store %arg6[%c0_14, %c128], %19 {strides = array<i32>} : memref<8x256xf32, #tpu.memory_space<vmem>>, vector<8x128xf32>,
    return
  }
  func.func @transform_0(%arg0: i32) -> (i32, i32) {
    %c0_i32 = arith.constant 0 : i32
    %c0_i32_0 = arith.constant 0 : i32
    return %arg0, %c0_i32 : i32, i32
  }
  func.func @transform_1(%arg0: i32) -> (i32, i32) {
    %c0_i32 = arith.constant 0 : i32
    %c0_i32_0 = arith.constant 0 : i32
    return %arg0, %c0_i32 : i32, i32
  }
  func.func @transform_2(%arg0: i32) -> (i32, i32) {
    %c0_i32 = arith.constant 0 : i32
    %c0_i32_0 = arith.constant 0 : i32
    %c0_i32_1 = arith.constant 0 : i32
    return %c0_i32, %c0_i32_0 : i32, i32
  }
  func.func @transform_3(%arg0: i32) -> (i32, i32) {
    %c0_i32 = arith.constant 0 : i32
    %c0_i32_0 = arith.constant 0 : i32
    %c0_i32_1 = arith.constant 0 : i32
    return %c0_i32, %c0_i32_0 : i32, i32
  }
  func.func @transform_4(%arg0: i32) -> (i32, i32) {
    %c0_i32 = arith.constant 0 : i32
    %c0_i32_0 = arith.constant 0 : i32
    return %arg0, %c0_i32 : i32, i32
  }
  func.func @transform_5(%arg0: i32) -> (i32, i32) {
    %c0_i32 = arith.constant 0 : i32
    %c0_i32_0 = arith.constant 0 : i32
    return %arg0, %c0_i32 : i32, i32
  }
}

</mosaic_0001>

<bundles_post_ra>
// kernel: gated_multimodal_forward.1
= control target key start
LH: loop header
LB: loop body
LE: loop exit
PB: predicated region body
PF: predicated region fallthrough
CT: control target
= control target key end

     0   :  { %s1352_s0 = inlined_call_operand.hbm [shape: f32[16,128], index: 0, kind: input, shape index: {}]   ;;  %s1353_s1 = inlined_call_operand.hbm [shape: f32[16,128], index: 1, kind: input, shape index: {}]   ;;  %s1354_s2 = inlined_call_operand.hbm [shape: f32[128,256], index: 2, kind: input, shape index: {}]   ;;  %s1355_s3 = inlined_call_operand.hbm [shape: f32[128,256], index: 3, kind: input, shape index: {}]   ;;  %s1356_s4 = inlined_call_operand.hbm [shape: f32[16,128], index: 4, kind: output, shape index: {0}]   ;;  %s1357_s5 = inlined_call_operand.hbm [shape: f32[16,256], index: 5, kind: output, shape index: {1}]  }
   0x1   :  { %1362 = sst [smem:[#allocation19_spill]] %s1354_s2 }
   0x2   :  { %1363 = sst [smem:[#allocation20_spill]] %s1355_s3 }
   0x3   :  { %11 = vsyncpa [#allocation3], 0 }
   0x4   :  { %13 = vsyncpa [#allocation3 + $0x1], 0 }
   0x5   :  { %14 = vsyncpa [#allocation6], 0 }
   0x6   :  { %16 = vsyncpa [#allocation6 + $0x1], 0 }
   0x7   :  { %17 = vsyncpa [#allocation9], 0 }
   0x8   :  { %18 = vsyncpa [#allocation4], 0 }
   0x9   :  { %20 = vsyncpa [#allocation4 + $0x1], 0 }
   0xa   :  { %21 = vsyncpa [#allocation12], 0 }
   0xb   :  { %23 = vsyncpa [#allocation12 + $0x1], 0  ;;  %s1088_s18 = smov 0   ;;  %s1090_s19 = smov 0  }
   0xc   :  { %s1092_s20 = smov 0   ;;  %s1094_s21 = smov 0  }
   0xd LB: > { %s1109_s22 = sadd.s32 4294967295, %s1047_s21   ;;  %s720_s23 = sadd.s32 4294967294, %s1047_s21   ;;  %s1047_s21 = sphi %s1094_s21, %s1385_s21   ;;  %s1043_s20 = sphi %s1092_s20, %s1384_s20   ;;  %s1039_s19 = sphi %s1090_s19, %s1383_s19   ;;  %s1035_s18 = sphi %s1088_s18, %s1382_s18  }
   0xe   : > { %p49_p0 = scmp.ne.s32.totalorder %s1039_s19, %s1035_s18  ;;  %p1358_p1 = scmp.eq.s32.totalorder %s1109_s22, 0 }
   0xf   : > { %p147_p3 = scmp.eq.s32.totalorder %s720_s23, 1  ;;  %p721_p5 = scmp.ge.s32.totalorder %s1047_s21, 1 }
  0x10   : > { %p1118_p4 = por %p1358_p1, %p49_p0  ;;  %p180_p7 = scmp.lt.s32.totalorder %s1047_s21, 3 }
  0x11   : > { %p1123_p6 = por %p147_p3, %p49_p0  ;;  %s1049_s27 = smov [#allocation7]  }
  0x12   : > { %s1364_s24 = scalar_select %p1118_p4, 1, 0 }
  0x13   : > { %s1365_s25 = scalar_select %p1123_p6, 1, 0 }
  0x14   : > { %p1128_p8 = pnand %p721_p5, %p180_p7  ;;  %s192_s28 = sshll.u32 %s1049_s27, 4  ;;  %s193_s28 = int_to_ptr.vmem [resolvable:$true] %s192_s28 }
  0x15   : > { %s1050_s30 = smov [#allocation8]   ;;  %s844_s7 = scalar_lea.vmem %s193_s28, 4096 }
  0x16   : > { %s1366_s26 = scalar_select %p1128_p8, 1, 0 }
  0x17   : > { %p761_p9 = pneg %p1128_p8  ;;  %s205_s6 = sshll.u32 %s1050_s30, 4  ;;  %s206_s6 = int_to_ptr.vmem [resolvable:$true] %s205_s6 }
  0x18   : > { %p845_p13 = scmp.ne.s32.totalorder %s193_s28, %s844_s7  ;;  %p852_p5 = scmp.lt.s32.totalorder %s193_s28, %s193_s28 }
  0x19   : > { %p1137_p11 = pnand %p761_p9, %p1358_p1  ;;  %p853_p7 = scmp.lt.s32.totalorder %s844_s7, %s844_s7 }
  0x1b   : > { %p835_p12 = pneg %p1137_p11  ;;  %p854_p10 = por %p853_p7, %p852_p5 }
  0x1d   : > { %p847_p0 = pnand %p845_p13, %p835_p12 }
  0x1f   : > { %p848_p3 = pneg %p847_p0 }
  0x21   : > { %p855_p9 = pnand %p854_p10, %p848_p3 }
  0x23   : > { %858 = shalt.err (!%p855_p9)
}
  0x24   : > { %s1051_s8 = smov 256   ;;  %s1052_s9 = smov 16  }
  0x25   : > { %s1368_s2 = sld [smem:[#allocation19_spill]]  ;;  %s870_s12 = scalar_lea.vmem %s206_s6, 4096 }
  0x26   : > { %p871_p1 = scmp.ne.s32.totalorder %s206_s6, %s870_s12  ;;  %p878_p2 = scmp.lt.s32.totalorder %s206_s6, %s206_s6 }
  0x27   : > { %p879_p6 = scmp.lt.s32.totalorder %s870_s12, %s870_s12 }
  0x28   : > { %p873_p13 = pnand %p871_p1, %p835_p12 }
  0x29   : > { %p880_p5 = por %p879_p6, %p878_p2 }
  0x2a   : > { %p874_p0 = pneg %p873_p13 }
  0x2b   : > { %764 = dma.hbm_to_vmem [thread:$0]  (!%p1137_p11), %s1368_s2, 4096, %s193_s28, [#allocation6], %s1051_s8, %s1051_s8, %s1052_s9  }
  0x2c   : > { %p881_p10 = pnand %p880_p5, %p874_p0 }
  0x2e   : > { %884 = shalt.err (!%p881_p10)
}
  0x2f   : > { %s1369_s3 = sld [smem:[#allocation20_spill]]  ;;  %s1160_s15 = sadd.s32 1, %s1047_s21  }
  0x30   : > { %s36_s16 = sadd.s32 1, %s1043_s20  ;;  %s33_s17 = ssub.s32 %s1047_s21, %s1160_s15 }
  0x31   : > { %p43_p1 = scmp.ne.s32.totalorder %s1043_s20, %s1039_s19  ;;  %p34_p2 = scmp.eq.s32.totalorder %s33_s17, 0 }
  0x32   : > { %p44_p6 = scmp.eq.s32.totalorder %s1047_s21, 0  ;;  %p1370_p12 = scmp.eq.s32.totalorder %s1109_s22, 1 }
  0x33   : > { %p784_p7 = scmp.lt.s32.totalorder %s1047_s21, 2  ;;  %s219_s28 = sand.u32 1, %s1043_s20  }
  0x34   : > { %p1170_p3 = por %p1370_p12, %p43_p1  ;;  %p45_p9 = por %p44_p6, %p43_p1 }
  0x35   : > { %767 = dma.hbm_to_vmem [thread:$0]  (!%p1137_p11), %s1369_s3, 4096, %s206_s6, [#allocation9], %s1051_s8, %s1051_s8, %s1052_s9  }
  0x36   : > { %s1371_s23 = scalar_select %p1170_p3, 1, 0 }
  0x37   : > { %s1176_s27 = scalar_select %p34_p2, %s1043_s20, %s36_s16  }
  0x38   : > { %s1179_s29 = sshll.u32 %s219_s28, 3  ;;  %s726_s30 = sshll.u32 %s1047_s21, 7 }
  0x39   : > { %s1185_s8 = scalar_lea.hbm %s1352_s0, %s726_s30  ;;  %s223_s9 = scalar_lea.vmem [#allocation2], %s1179_s29 }
  0x3a   : > { %s230_s10 = sshll.u32 %s223_s9, 4  ;;  %p1190_p11 = pnand %p784_p7, %p45_p9  ;;  %s1188_s10 = int_to_ptr.vmem [resolvable:$true] %s230_s10 }
  0x3b   : > { %s1197_s14 = scalar_lea.hbm %s1353_s1, %s726_s30  ;;  %s237_s16 = sand.u32 1, %s1047_s21  }
  0x3c   : > { %s220_s17 = scalar_lea.sflag [#allocation3], %s219_s28  ;;  %s885_s6 = scalar_lea.hbm %s1185_s8, 128 }
  0x3d   : > { %p886_p13 = scmp.ne.s32.totalorder %s1185_s8, %s885_s6  ;;  %p887_p0 = pneg %p1190_p11 }
  0x3e   : > { %s890_s2 = scalar_lea.hbm %s1352_s0, 256  ;;  %p891_p1 = scmp.lt.s32.totalorder %s1185_s8, %s1352_s0 }
  0x3f   : > { %p888_p5 = pnand %p887_p0, %p886_p13  ;;  %p892_p2 = scmp.lt.s32.totalorder %s890_s2, %s885_s6 }
  0x41   : > { %p889_p10 = pneg %p888_p5  ;;  %p893_p6 = por %p892_p2, %p891_p1 }
  0x43   : > { %p894_p12 = pnand %p893_p6, %p889_p10 }
  0x45   : > { %897 = shalt.err (!%p894_p12)
}
  0x46   : > { %s898_s28 = scalar_lea.vmem %s1188_s10, 128  ;;  %s1053_s30 = smov [#allocation2]  }
  0x47   : > { %p899_p7 = scmp.ne.s32.totalorder %s1188_s10, %s898_s28  ;;  %s903_s13 = sshll.u32 %s1053_s30, 4  ;;  %s904_s13 = int_to_ptr.vmem [resolvable:$false] %s903_s13 }
  0x48   : > { %s905_s7 = scalar_lea.vmem %s904_s13, 256  ;;  %p906_p5 = scmp.lt.s32.totalorder %s1188_s10, %s904_s13 }
  0x49   : > { %p901_p9 = pnand %p899_p7, %p887_p0  ;;  %p907_p3 = scmp.lt.s32.totalorder %s905_s7, %s898_s28 }
  0x4b   : > { %p902_p13 = pneg %p901_p9  ;;  %p908_p4 = por %p907_p3, %p906_p5 }
  0x4d   : > { %p909_p1 = pnand %p908_p4, %p902_p13 }
  0x4f   : > { %912 = shalt.err (!%p909_p1)
}
  0x50   : > { %771 = dma.hbm_to_vmem [thread:$0]  (!%p1190_p11), %s1185_s8, 128, %s1188_s10, %s220_s17  }
  0x51   : > { %s241_s2 = scalar_lea.vmem [#allocation5], %s1179_s29  ;;  %s238_s6 = scalar_lea.sflag [#allocation6], %s237_s16 }
  0x52   : > { %s248_s3 = sshll.u32 %s241_s2, 4  ;;  %s913_s9 = scalar_lea.hbm %s1197_s14, 128  ;;  %s249_s3 = int_to_ptr.vmem [resolvable:$true] %s248_s3 }
  0x53   : > { %p914_p3 = scmp.ne.s32.totalorder %s1197_s14, %s913_s9  ;;  %s918_s30 = scalar_lea.hbm %s1353_s1, 256 }
  0x54   : > { %p919_p2 = scmp.lt.s32.totalorder %s1197_s14, %s1353_s1  ;;  %p920_p6 = scmp.lt.s32.totalorder %s918_s30, %s913_s9 }
  0x55   : > { %p916_p4 = pnand %p914_p3, %p887_p0 }
  0x56   : > { %p921_p12 = por %p920_p6, %p919_p2 }
  0x57   : > { %p917_p10 = pneg %p916_p4 }
  0x59   : > { %p922_p7 = pnand %p921_p12, %p917_p10 }
  0x5b   : > { %925 = shalt.err (!%p922_p7)
}
  0x5c   : > { %s926_s29 = scalar_lea.vmem %s249_s3, 128  ;;  %s1054_s8 = smov [#allocation5]  }
  0x5d   : > { %p927_p9 = scmp.ne.s32.totalorder %s249_s3, %s926_s29  ;;  %s931_s10 = sshll.u32 %s1054_s8, 4  ;;  %s932_s10 = int_to_ptr.vmem [resolvable:$false] %s931_s10 }
  0x5e   : > { %s933_s16 = scalar_lea.vmem %s932_s10, 256  ;;  %p934_p1 = scmp.lt.s32.totalorder %s249_s3, %s932_s10 }
  0x5f   : > { %p929_p13 = pnand %p927_p9, %p887_p0  ;;  %p935_p3 = scmp.lt.s32.totalorder %s933_s16, %s926_s29 }
  0x61   : > { %p930_p5 = pneg %p929_p13  ;;  %p936_p4 = por %p935_p3, %p934_p1 }
  0x63   : > { %p937_p8 = pnand %p936_p4, %p930_p5 }
  0x65   : > { %940 = shalt.err (!%p937_p8)
}
  0x66   : > { %774 = dma.hbm_to_vmem [thread:$0]  (!%p1190_p11), %s1197_s14, 128, %s249_s3, %s238_s6  }
  0x67   : > { %p1373_p10 = scmp.ne.s32.totalorder %s1366_s26, 0 }
  0x68   : > { %s1248_s17 = sand.u32 (!%p1373_p10), 1, %s1039_s19   ;;  %p1374_p0 = scmp.ne.s32.totalorder (!%p1373_p10), %s1364_s24, 0 }
  0x69   : > { %257 = sbr.rel (%p1373_p10) target bundleno = 420 (0x1a4), region = 36  ;;  %s1251_s2 = sshll.u32 (!%p1373_p10), %s1248_s17, 3 }
  0x6a   : > { %s260_s9 = scalar_lea.sflag (!%p1373_p10), [#allocation3], %s1248_s17  ;;  %s263_s12 = scalar_lea.vmem (!%p1373_p10), [#allocation2], %s1251_s2 }
  0x6e   : > { %1010 = dma.done.wait (%p1374_p0), %s260_s9, 128  }
  0x6f   : > { %1012 = vsyncadd (%p1374_p0), %s260_s9, 4294967168  ;;  %s268_s26 = sand.u32 1, %s1109_s22   ;;  %s272_s14 = scalar_lea.vmem [#allocation5], %s1251_s2 }
  0x70   : > { %s269_s11 = scalar_lea.sflag [#allocation6], %s268_s26 }
  0x71   : > { %1014 = dma.done.wait (%p1374_p0), %s269_s11, 128  }
  0x72   : > { %1016 = vsyncadd (%p1374_p0), %s269_s11, 4294967168  ;;  %p1375_p8 = scmp.eq.s32.totalorder %s1109_s22, 0 }
  0x74   : > { %1018 = dma.done.wait (%p1375_p8), [#allocation6], 4096   ;;  %p1376_p11 = pmov %p1375_p8 }
  0x75   : > { %p1377_p2 = pmov %p1375_p8 }
  0x76   : > { %1020 = vsyncadd (%p1376_p11), [#allocation6], 4294963200 }
  0x77   : > { %1022 = dma.done.wait (%p1377_p2), [#allocation9], 4096   ;;  %p1378_p6 = pmov %p1377_p2 }
  0x78   : > { %v1055_v0 = vmov 0.0   ;;  %v350_v1 = vld [vmem:[#allocation7 + $0xf8] sm:$0xff]  ;;  %v349_v3 = vld [vmem:[#allocation7 + $0xf0] sm:$0xff]  ;;  %v348_v5 = vld [vmem:[#allocation7 + $0xe8] sm:$0xff]  ;;  %s735_s24 = sshll.u32 %s1248_s17, 4  ;;  %s744_s3 = sshll.u32 %s1109_s22, 8 }
  0x79   : > { %1024 = vsyncadd (%p1378_p6), [#allocation9], 4294963200  ;;  %415 = vmatprep.mubr.f32.mxu0 %v1055_v0  ;;  %518 = vmatprep.mubr.f32.mxu1 %v1055_v0  ;;  %v453_v2 = vld [vmem:[#allocation8 + $0xf8] sm:$0xff]  ;;  %v452_v4 = vld [vmem:[#allocation8 + $0xf0] sm:$0xff]  ;;  %s316_s6 = scalar_lea.vmem [#allocation11], %s735_s24  ;;  %s1282_s7 = scalar_lea.hbm %s1357_s5, %s744_s3 }
  0x7a   : > { %351 = vmatprep.subr.mxu0 %v350_v1  ;;  %454 = vmatprep.subr.mxu1 %v453_v2  ;;  %v451_v6 = vld [vmem:[#allocation8 + $0xe8] sm:$0xff]  ;;  %v347_v7 = vld [vmem:[#allocation7 + $0xe0] sm:$0xff]  ;;  %v346_v9 = vld [vmem:[#allocation7 + $0xd8] sm:$0xff]  ;;  %s576_s28 = sshll.u32 %s316_s6, 4  ;;  %s739_s29 = sshll.u32 %s1109_s22, 7  ;;  %s1284_s28 = int_to_ptr.vmem [resolvable:$true] %s576_s28 }
  0x7b   : > { %352 = vmatpush1.msra.mxu0 %v349_v3  ;;  %455 = vmatpush1.msra.mxu1 %v452_v4  ;;  %v450_v8 = vld [vmem:[#allocation8 + $0xe0] sm:$0xff]  ;;  %v449_v10 = vld [vmem:[#allocation8 + $0xd8] sm:$0xff]  ;;  %v345_v11 = vld [vmem:[#allocation7 + $0xd0] sm:$0xff]  ;;  %s309_s8 = scalar_lea.vmem [#allocation10], %s1251_s2  ;;  %s549_s16 = scalar_lea.sflag [#allocation12], %s1248_s17 }
  0x7c   : > { %353 = vmatprep.subr.mxu0 %v348_v5  ;;  %456 = vmatprep.subr.mxu1 %v451_v6  ;;  %v448_v12 = vld [vmem:[#allocation8 + $0xd0] sm:$0xff]  ;;  %v344_v13 = vld [vmem:[#allocation7 + $0xc8] sm:$0xff]  ;;  %v343_v15 = vld [vmem:[#allocation7 + $0xc0] sm:$0xff]  ;;  %s1290_s10 = sshll.u32 %s309_s8, 4  ;;  %s941_s9 = scalar_lea.vmem %s1284_s28, 256  ;;  %s563_s10 = int_to_ptr.vmem [resolvable:$true] %s1290_s10 }
  0x7d   : > { %354 = vmatpush1.msra.mxu0 %v347_v7  ;;  %457 = vmatpush1.msra.mxu1 %v450_v8  ;;  %v447_v14 = vld [vmem:[#allocation8 + $0xc8] sm:$0xff]  ;;  %v446_v16 = vld [vmem:[#allocation8 + $0xc0] sm:$0xff]  ;;  %v342_v17 = vld [vmem:[#allocation7 + $0xb8] sm:$0xff]  ;;  %p942_p12 = scmp.ne.s32.totalorder %s1284_s28, %s941_s9  ;;  %p1379_p7 = scmp.ne.s32.totalorder %s1371_s23, 0 }
  0x7e   : > { %355 = vmatprep.subr.mxu0 %v346_v9  ;;  %458 = vmatprep.subr.mxu1 %v449_v10  ;;  %v445_v18 = vld [vmem:[#allocation8 + $0xb8] sm:$0xff]  ;;  %v341_v19 = vld [vmem:[#allocation7 + $0xb0] sm:$0xff]  ;;  %v340_v21 = vld [vmem:[#allocation7 + $0xa8] sm:$0xff] }
  0x7f   : > { %356 = vmatpush1.msra.mxu0 %v345_v11  ;;  %459 = vmatpush1.msra.mxu1 %v448_v12  ;;  %v444_v20 = vld [vmem:[#allocation8 + $0xb0] sm:$0xff]  ;;  %v443_v22 = vld [vmem:[#allocation8 + $0xa8] sm:$0xff]  ;;  %v339_v23 = vld [vmem:[#allocation7 + $0xa0] sm:$0xff]  ;;  %p943_p9 = pnand %p942_p12, %p1379_p7 }
  0x80   : > { %357 = vmatprep.subr.mxu0 %v344_v13  ;;  %460 = vmatprep.subr.mxu1 %v447_v14  ;;  %v442_v24 = vld [vmem:[#allocation8 + $0xa0] sm:$0xff]  ;;  %v338_v25 = vld [vmem:[#allocation7 + $0x98] sm:$0xff]  ;;  %v337_v27 = vld [vmem:[#allocation7 + $0x90] sm:$0xff] }
  0x81   : > { %358 = vmatpush1.msra.mxu0 %v343_v15  ;;  %461 = vmatpush1.msra.mxu1 %v446_v16  ;;  %v441_v26 = vld [vmem:[#allocation8 + $0x98] sm:$0xff]  ;;  %v440_v28 = vld [vmem:[#allocation8 + $0x90] sm:$0xff]  ;;  %v336_v29 = vld [vmem:[#allocation7 + $0x88] sm:$0xff]  ;;  %p944_p13 = pneg %p943_p9 }
  0x82   : > { %359 = vmatprep.subr.mxu0 %v342_v17  ;;  %462 = vmatprep.subr.mxu1 %v445_v18  ;;  %v439_v30 = vld [vmem:[#allocation8 + $0x88] sm:$0xff]  ;;  %v335_v31 = vld [vmem:[#allocation7 + $0x80] sm:$0xff]  ;;  %v334_v33 = vld [vmem:[#allocation7 + $0x78] sm:$0xff] }
  0x83   : > { %360 = vmatpush1.msra.mxu0 %v341_v19  ;;  %463 = vmatpush1.msra.mxu1 %v444_v20  ;;  %v438_v32 = vld [vmem:[#allocation8 + $0x80] sm:$0xff]  ;;  %v437_v34 = vld [vmem:[#allocation8 + $0x78] sm:$0xff]  ;;  %v333_v35 = vld [vmem:[#allocation7 + $0x70] sm:$0xff] }
  0x84   : > { %361 = vmatprep.subr.mxu0 %v340_v21  ;;  %464 = vmatprep.subr.mxu1 %v443_v22  ;;  %v436_v36 = vld [vmem:[#allocation8 + $0x70] sm:$0xff]  ;;  %v332_v37 = vld [vmem:[#allocation7 + $0x68] sm:$0xff]  ;;  %v331_v39 = vld [vmem:[#allocation7 + $0x60] sm:$0xff] }
  0x85   : > { %362 = vmatpush1.msra.mxu0 %v339_v23  ;;  %465 = vmatpush1.msra.mxu1 %v442_v24  ;;  %v435_v38 = vld [vmem:[#allocation8 + $0x68] sm:$0xff]  ;;  %v434_v40 = vld [vmem:[#allocation8 + $0x60] sm:$0xff]  ;;  %v330_v41 = vld [vmem:[#allocation7 + $0x58] sm:$0xff] }
  0x86   : > { %363 = vmatprep.subr.mxu0 %v338_v25  ;;  %466 = vmatprep.subr.mxu1 %v441_v26  ;;  %v433_v42 = vld [vmem:[#allocation8 + $0x58] sm:$0xff]  ;;  %v329_v43 = vld [vmem:[#allocation7 + $0x50] sm:$0xff]  ;;  %v328_v45 = vld [vmem:[#allocation7 + $0x48] sm:$0xff] }
  0x87   : > { %364 = vmatpush1.msra.mxu0 %v337_v27  ;;  %467 = vmatpush1.msra.mxu1 %v440_v28  ;;  %v432_v44 = vld [vmem:[#allocation8 + $0x50] sm:$0xff]  ;;  %v431_v46 = vld [vmem:[#allocation8 + $0x48] sm:$0xff]  ;;  %v327_v47 = vld [vmem:[#allocation7 + $0x40] sm:$0xff] }
  0x88   : > { %365 = vmatprep.subr.mxu0 %v336_v29  ;;  %468 = vmatprep.subr.mxu1 %v439_v30  ;;  %v430_v48 = vld [vmem:[#allocation8 + $0x40] sm:$0xff]  ;;  %v326_v49 = vld [vmem:[#allocation7 + $0x38] sm:$0xff]  ;;  %v325_v51 = vld [vmem:[#allocation7 + $0x30] sm:$0xff] }
  0x89   : > { %366 = vmatpush1.msra.mxu0 %v335_v31  ;;  %469 = vmatpush1.msra.mxu1 %v438_v32  ;;  %v429_v50 = vld [vmem:[#allocation8 + $0x38] sm:$0xff]  ;;  %v428_v52 = vld [vmem:[#allocation8 + $0x30] sm:$0xff]  ;;  %v324_v53 = vld [vmem:[#allocation7 + $0x28] sm:$0xff] }
  0x8a   : > { %367 = vmatprep.subr.mxu0 %v334_v33  ;;  %470 = vmatprep.subr.mxu1 %v437_v34  ;;  %v427_v54 = vld [vmem:[#allocation8 + $0x28] sm:$0xff]  ;;  %v323_v55 = vld [vmem:[#allocation7 + $0x20] sm:$0xff]  ;;  %v322_v57 = vld [vmem:[#allocation7 + $0x18] sm:$0xff] }
  0x8b   : > { %368 = vmatpush1.msra.mxu0 %v333_v35  ;;  %471 = vmatpush1.msra.mxu1 %v436_v36  ;;  %v426_v56 = vld [vmem:[#allocation8 + $0x20] sm:$0xff]  ;;  %v425_v58 = vld [vmem:[#allocation8 + $0x18] sm:$0xff]  ;;  %v321_v59 = vld [vmem:[#allocation7 + $0x10] sm:$0xff] }
  0x8c   : > { %369 = vmatprep.subr.mxu0 %v332_v37  ;;  %472 = vmatprep.subr.mxu1 %v435_v38  ;;  %v424_v60 = vld [vmem:[#allocation8 + $0x10] sm:$0xff]  ;;  %v320_v61 = vld [vmem:[#allocation7 + $0x8] sm:$0xff]  ;;  %v319_v63 = vld [vmem:[#allocation7] sm:$0xff] }
  0x8d   : > { %370 = vmatpush1.msra.mxu0 %v331_v39  ;;  %473 = vmatpush1.msra.mxu1 %v434_v40  ;;  %v423_v62 = vld [vmem:[#allocation8 + $0x8] sm:$0xff]  ;;  %v422_v0 = vld [vmem:[#allocation8] sm:$0xff]  ;;  %v318_v2 = vld [vmem:[%s272_s14] sm:$0xff] }
  0x8e   : > { %371 = vmatprep.subr.mxu0 %v330_v41  ;;  %474 = vmatprep.subr.mxu1 %v433_v42  ;;  %v317_v1 = vld [vmem:[%s263_s12] sm:$0xff]  ;;  %s1056_s12 = smov [#allocation11]  }
  0x8f   : > { %372 = vmatpush1.msra.mxu0 %v329_v43  ;;  %475 = vmatpush1.msra.mxu1 %v432_v44  ;;  %s945_s26 = sshll.u32 %s1056_s12, 4  ;;  %s946_s26 = int_to_ptr.vmem [resolvable:$false] %s945_s26 }
  0x90   : > { %373 = vmatprep.subr.mxu0 %v328_v45  ;;  %476 = vmatprep.subr.mxu1 %v431_v46  ;;  %s947_s11 = scalar_lea.vmem %s946_s26, 512  ;;  %p948_p5 = scmp.lt.s32.totalorder %s1284_s28, %s946_s26 }
  0x91   : > { %374 = vmatpush1.msra.mxu0 %v327_v47  ;;  %477 = vmatpush1.msra.mxu1 %v430_v48  ;;  %p949_p1 = scmp.lt.s32.totalorder %s947_s11, %s941_s9 }
  0x92   : > { %375 = vmatprep.subr.mxu0 %v326_v49  ;;  %478 = vmatprep.subr.mxu1 %v429_v50 }
  0x93   : > { %376 = vmatpush1.msra.mxu0 %v325_v51  ;;  %479 = vmatpush1.msra.mxu1 %v428_v52  ;;  %p950_p3 = por %p949_p1, %p948_p5 }
  0x94   : > { %377 = vmatprep.subr.mxu0 %v324_v53  ;;  %480 = vmatprep.subr.mxu1 %v427_v54 }
  0x95   : > { %378 = vmatpush1.msra.mxu0 %v323_v55  ;;  %481 = vmatpush1.msra.mxu1 %v426_v56  ;;  %p951_p4 = pnand %p950_p3, %p944_p13 }
  0x96   : > { %379 = vmatprep.subr.mxu0 %v322_v57  ;;  %482 = vmatprep.subr.mxu1 %v425_v58 }
  0x97   : > { %380 = vmatpush1.msra.mxu0 %v321_v59  ;;  %483 = vmatpush1.msra.mxu1 %v424_v60 }
  0x98   : > { %381 = vmatprep.subr.mxu0 %v320_v61  ;;  %484 = vmatprep.subr.mxu1 %v423_v62 }
  0x99   : > { %382 = vmatpush1.msra.mxu0 %v319_v63  ;;  %485 = vmatpush1.msra.mxu1 %v422_v0 }
  0x9a   : > { %416 = vmatmul.mubr.f32.vlgmr.msra.gmra.mxu0 %v317_v1  ;;  %519 = vmatmul.mubr.f32.vlgmr.msra.gmra.mxu1 %v318_v2 }
 0x15a   : > { %v417_v3 = vpop.f32.mrf.mxu0  ;;  %v520_v4 = vpop.f32.mrf.mxu1 }
 0x15c   : > { %v419_v5 = vpop.f32.mrf.mxu0  ;;  %v522_v6 = vpop.f32.mrf.mxu1 }
 0x15d   : > { %v527_v7 = vadd.f32 %v522_v6, %v419_v5 }
 0x15f   : > { %v736_v8 = vmul.f32 -1.442695, %v527_v7 }
 0x161   : > { %825 = vpow2.f32 %v736_v8 }
 0x162   : > { %827 = vtanh.f32 %v417_v3 }
 0x16e   : > { %v826_v9 = vpop.eup %825 }
 0x16f   : > { %v531_v10 = vadd.f32 1.0, %v826_v9  ;;  %v828_v11 = vpop.eup %827 }
 0x171   : > { %829 = vrcp.f32 %v531_v10 }
 0x172   : > { %831 = vtanh.f32 %v520_v4 }
 0x17e   : > { %v830_v12 = vpop.eup %829 }
 0x17f   : > { %v534_v13 = vsub.f32 1.0, %v830_v12  ;;  %v535_v14 = vmul.f32 %v830_v12, %v828_v11  ;;  %541 = vst [vmem:[%s316_s6] sm:$0xff] %v830_v12  ;;  %v832_v15 = vpop.eup %831 }
 0x181   : > { %v537_v16 = vmul.f32 %v832_v15, %v534_v13  ;;  %542 = vst [vmem:[%s316_s6 + $0x8] sm:$0xff] %v534_v13 }
 0x182   : > { %954 = shalt.err (!%p951_p4)
}
 0x183   : > { %s955_s14 = scalar_lea.hbm %s1282_s7, 256  ;;  %s959_s6 = scalar_lea.hbm %s1357_s5, 512 }
 0x184   : > { %p956_p10 = scmp.ne.s32.totalorder %s1282_s7, %s955_s14  ;;  %p960_p11 = scmp.lt.s32.totalorder %s1282_s7, %s1357_s5 }
 0x185   : > { %p961_p2 = scmp.lt.s32.totalorder %s959_s6, %s955_s14 }
 0x186   : > { %p957_p0 = pnand %p956_p10, %p1379_p7 }
 0x187   : > { %p962_p6 = por %p961_p2, %p960_p11 }
 0x188   : > { %p958_p8 = pneg %p957_p0 }
 0x18a   : > { %p963_p12 = pnand %p962_p6, %p958_p8 }
 0x18c   : > { %966 = shalt.err (!%p963_p12)
}
 0x18d   : > { %758 = dma.vmem_to_hbm [thread:$0]  (%p1379_p7), %s1284_s28, 256, %s1282_s7, %s549_s16   ;;  %v536_v17 = vmul.f32 %v535_v14, %v317_v1  ;;  %v538_v18 = vmul.f32 %v537_v16, %v318_v2 }
 0x18e   : > { %s560_s26 = scalar_lea.hbm %s1356_s4, %s739_s29  ;;  %s544_s11 = scalar_lea.sflag [#allocation4], %s1248_s17 }
 0x18f   : > { %v539_v19 = vadd.f32 %v538_v18, %v536_v17  ;;  %s967_s14 = scalar_lea.vmem %s563_s10, 128  ;;  %s1057_s24 = smov [#allocation10]  }
 0x190   : > { %p968_p9 = scmp.ne.s32.totalorder %s563_s10, %s967_s14  ;;  %s971_s3 = sshll.u32 %s1057_s24, 4  ;;  %s972_s3 = int_to_ptr.vmem [resolvable:$false] %s971_s3 }
 0x191   : > { %540 = vst [vmem:[%s309_s8] sm:$0xff] %v539_v19  ;;  %s973_s28 = scalar_lea.vmem %s972_s3, 256  ;;  %p974_p1 = scmp.lt.s32.totalorder %s563_s10, %s972_s3 }
 0x192   : > { %p969_p13 = pnand %p968_p9, %p1379_p7  ;;  %p975_p3 = scmp.lt.s32.totalorder %s973_s28, %s967_s14 }
 0x194   : > { %p970_p5 = pneg %p969_p13  ;;  %p976_p4 = por %p975_p3, %p974_p1 }
 0x196   : > { %p977_p10 = pnand %p976_p4, %p970_p5 }
 0x198   : > { %980 = shalt.err (!%p977_p10)
}
 0x199   : > { %s981_s22 = scalar_lea.hbm %s560_s26, 128  ;;  %s985_s7 = scalar_lea.hbm %s1356_s4, 256 }
 0x19a   : > { %p982_p0 = scmp.ne.s32.totalorder %s560_s26, %s981_s22  ;;  %p986_p2 = scmp.lt.s32.totalorder %s560_s26, %s1356_s4 }
 0x19b   : > { %p987_p6 = scmp.lt.s32.totalorder %s985_s7, %s981_s22 }
 0x19c   : > { %p983_p8 = pnand %p982_p0, %p1379_p7 }
 0x19d   : > { %p988_p12 = por %p987_p6, %p986_p2 }
 0x19e   : > { %p984_p11 = pneg %p983_p8 }
 0x1a0   : > { %p989_p9 = pnand %p988_p12, %p984_p11 }
 0x1a2   : > { %992 = shalt.err (!%p989_p9)
}
 0x1a3   : > { %757 = dma.vmem_to_hbm [thread:$0]  (%p1379_p7), %s563_s10, 128, %s560_s26, %s544_s11  }
 0x1a4 PF: > { %s588_s16 = sand.u32 1, %s1035_s18   ;;  %p1380_p13 = scmp.ne.s32.totalorder %s1365_s25, 0 }
 0x1a5   : > { %p1381_p5 = scmp.ge.s32.totalorder %s1047_s21, 2  ;;  %s589_s6 = scalar_lea.sflag [#allocation4], %s588_s16 }
 0x1a7   : > { %p776_p1 = pnand %p1381_p5, %p1380_p13 }
 0x1a9   : > { %p777_p3 = pneg %p776_p1 }
 0x1ab   : > { %1026 = dma.done.wait (%p777_p3), %s589_s6, 128  }
 0x1ac   : > { %1028 = vsyncadd (%p777_p3), %s589_s6, 4294967168  ;;  %s598_s30 = scalar_lea.sflag [#allocation12], %s588_s16 }
 0x1ad   : > { %1030 = dma.done.wait (%p777_p3), %s598_s30, 256  }
 0x1ae   : > { %1032 = vsyncadd (%p777_p3), %s598_s30, 4294967040  ;;  %p26_p7 = scmp.ge.s32.totalorder %s1160_s15, 4   ;;  %s1382_s18 = smov %s1039_s19 }
 0x1af   : > { %s1383_s19 = smov %s1043_s20  ;;  %s1384_s20 = smov %s1176_s27 }
 0x1b0   : > { %s1385_s21 = smov %s1160_s15  ;;  %28 = sbr.rel (!%p26_p7) target bundleno = 13 (0xd), region = 119 }
 0x1b5   :  { %603 = vsyncpa [#allocation3], 1 }
 0x1b6   :  { %605 = vsyncpa [#allocation3 + $0x1], 1 }
 0x1b7   :  { %606 = vsyncpa [#allocation6], 1 }
 0x1b8   :  { %608 = vsyncpa [#allocation6 + $0x1], 1 }
 0x1b9   :  { %609 = vsyncpa [#allocation9], 1 }
 0x1ba   :  { %610 = vsyncpa [#allocation4], 1 }
 0x1bb   :  { %612 = vsyncpa [#allocation4 + $0x1], 1 }
 0x1bc   :  { %613 = vsyncpa [#allocation12], 1 }
 0x1bd   :  { %615 = vsyncpa [#allocation12 + $0x1], 1 }

</bundles_post_ra>
